<compile_context>
chip_gen: v5e
topology: v5e:2x2
jax: 0.10.0
libtpu: 0.0.40
codegen_flags: <defaults>
</compile_context>

<pallas_src>
import math
from functools import partial

import jax
import jax.numpy as jnp
from jax import lax
from jax.experimental import pallas as pl
from jax.experimental.pallas import tpu as pltpu

# Conservative scoped-VMEM budget: fits v7x (64 MiB physical) with headroom,
# and is well under the 128 MiB of v5e/v6e.
VMEM_LIMIT_BYTES = 48 * 1024 * 1024


def _pick_tile(dim, pref, align):
    """Largest tile <= pref that divides `dim` and is a multiple of `align`.

    Falls back to the full dimension (always a legal block shape)."""
    if dim <= pref:
        return dim
    t = (pref // align) * align
    while t >= align:
        if dim % t == 0:
            return t
        t -= align
    return dim


# ---------------------------------------------------------------------------
# Fused RMSNorm + matmul  (used for the QKV projection)
# ---------------------------------------------------------------------------
def _rms_matmul_kernel(eps, x_ref, nw_ref, w_ref, o_ref):
    x = x_ref[...].astype(jnp.float32)                       # (tm, D)
    ms = jnp.mean(x * x, axis=-1, keepdims=True)
    xn = (x * lax.rsqrt(ms + eps)) * nw_ref[...]             # RMSNorm in f32
    o_ref[...] = jnp.dot(xn, w_ref[...],
                         preferred_element_type=jnp.float32).astype(o_ref.dtype)


def rms_matmul(x2d, norm_w, w_t, eps, *, tm_pref=256, tn_pref=512):
    """out = rmsnorm(x2d) @ w_t      x2d: (M, D), w_t: (D, N) -> (M, N)

    The norm needs the full row, so K (=D) is not tiled; the cheap norm is
    recomputed per N-tile and overlaps with the MXU work.
    """
    M, D = x2d.shape
    N = w_t.shape[1]
    tm = _pick_tile(M, tm_pref, 8)
    tn = _pick_tile(N, tn_pref, 128)
    return pl.pallas_call(
        partial(_rms_matmul_kernel, eps),
        out_shape=jax.ShapeDtypeStruct((M, N), x2d.dtype),
        grid=(M // tm, N // tn),
        in_specs=[pl.BlockSpec((tm, D), lambda i, j: (i, 0)),
                  pl.BlockSpec((1, D), lambda i, j: (0, 0)),
                  pl.BlockSpec((D, tn), lambda i, j: (0, j))],
        out_specs=pl.BlockSpec((tm, tn), lambda i, j: (i, j)),
        compiler_params=pltpu.CompilerParams(
            dimension_semantics=("parallel", "parallel"),
            vmem_limit_bytes=VMEM_LIMIT_BYTES),
    )(x2d, norm_w.reshape(1, D), w_t)


# ---------------------------------------------------------------------------
# Fused RMSNorm + SwiGLU gate  (silu(x@w1) * (x@w3))
# ---------------------------------------------------------------------------
def _rms_swiglu_kernel(eps, x_ref, nw_ref, w1_ref, w3_ref, o_ref):
    x = x_ref[...].astype(jnp.float32)                       # (tm, D)
    ms = jnp.mean(x * x, axis=-1, keepdims=True)
    xn = (x * lax.rsqrt(ms + eps)) * nw_ref[...]
    h1 = jnp.dot(xn, w1_ref[...], preferred_element_type=jnp.float32)
    h3 = jnp.dot(xn, w3_ref[...], preferred_element_type=jnp.float32)
    o_ref[...] = (h1 * jax.nn.sigmoid(h1) * h3).astype(o_ref.dtype)


def rms_swiglu(x2d, norm_w, w1_t, w3_t, eps, *, tm_pref=256, tn_pref=512):
    M, D = x2d.shape
    H = w1_t.shape[1]
    tm = _pick_tile(M, tm_pref, 8)
    tn = _pick_tile(H, tn_pref, 128)
    return pl.pallas_call(
        partial(_rms_swiglu_kernel, eps),
        out_shape=jax.ShapeDtypeStruct((M, H), x2d.dtype),
        grid=(M // tm, H // tn),
        in_specs=[pl.BlockSpec((tm, D), lambda i, j: (i, 0)),
                  pl.BlockSpec((1, D), lambda i, j: (0, 0)),
                  pl.BlockSpec((D, tn), lambda i, j: (0, j)),
                  pl.BlockSpec((D, tn), lambda i, j: (0, j))],
        out_specs=pl.BlockSpec((tm, tn), lambda i, j: (i, j)),
        compiler_params=pltpu.CompilerParams(
            dimension_semantics=("parallel", "parallel"),
            vmem_limit_bytes=VMEM_LIMIT_BYTES),
    )(x2d, norm_w.reshape(1, D), w1_t, w3_t)


# ---------------------------------------------------------------------------
# Tiled matmul with K-axis accumulator and fused residual add
#   out = res + x @ w_t
# ---------------------------------------------------------------------------
def _matmul_residual_kernel(x_ref, w_ref, res_ref, o_ref, acc_ref):
    @pl.when(pl.program_id(2) == 0)
    def _():
        acc_ref[...] = res_ref[...].astype(jnp.float32)      # residual seeds acc

    acc_ref[...] += jnp.dot(x_ref[...], w_ref[...],
                            preferred_element_type=jnp.float32)

    @pl.when(pl.program_id(2) == pl.num_programs(2) - 1)
    def _():
        o_ref[...] = acc_ref[...].astype(o_ref.dtype)


def matmul_residual(x2d, w_t, res2d, *, tm_pref=256, tn_pref=256, tk_pref=512):
    M, K = x2d.shape
    N = w_t.shape[1]
    tm = _pick_tile(M, tm_pref, 8)
    tn = _pick_tile(N, tn_pref, 128)
    tk = _pick_tile(K, tk_pref, 128)
    return pl.pallas_call(
        _matmul_residual_kernel,
        out_shape=jax.ShapeDtypeStruct((M, N), res2d.dtype),
        grid=(M // tm, N // tn, K // tk),
        in_specs=[pl.BlockSpec((tm, tk), lambda i, j, k: (i, k)),
                  pl.BlockSpec((tk, tn), lambda i, j, k: (k, j)),
                  pl.BlockSpec((tm, tn), lambda i, j, k: (i, j))],
        out_specs=pl.BlockSpec((tm, tn), lambda i, j, k: (i, j)),
        scratch_shapes=[pltpu.VMEM((tm, tn), jnp.float32)],
        compiler_params=pltpu.CompilerParams(
            dimension_semantics=("parallel", "parallel", "arbitrary"),
            vmem_limit_bytes=VMEM_LIMIT_BYTES),
    )(x2d, w_t, res2d)


# ---------------------------------------------------------------------------
# Flash-style GQA attention over KV tiles, directly on the cache layout
#   q: (B, S, Hq, Dh)   k/v: (B, T, Hkv, Dh)   out: (B, S, Hq, Dh)
# No repeat_kv, no transposes: query head h reads kv head h // n_rep in-kernel.
# ---------------------------------------------------------------------------
def _flash_gqa_kernel(scale, n_rep, n_q_heads,
                      q_ref, k_ref, v_ref, o_ref, m_sc, l_sc, acc_sc):
    t = pl.program_id(1)

    @pl.when(t == 0)
    def _():
        m_sc[...] = jnp.full_like(m_sc, -1e30)
        l_sc[...] = jnp.zeros_like(l_sc)
        acc_sc[...] = jnp.zeros_like(acc_sc)

    # Fold 1/sqrt(Dh) into q (S*Dh elements) instead of scaling the score tile.
    q = q_ref[0].astype(jnp.float32) * scale                 # (S, Hq, Dh)
    k = k_ref[0].astype(jnp.float32)                         # (tkv, Hkv, Dh)
    v = v_ref[0].astype(jnp.float32)                         # (tkv, Hkv, Dh)

    for h in range(n_q_heads):                               # static unroll
        g = h // n_rep                                       # shared KV head
        qh = q[:, h, :]                                      # (S, Dh)
        kh = k[:, g, :]                                      # (tkv, Dh)
        vh = v[:, g, :]
        s = lax.dot_general(qh, kh, (((1,), (1,)), ((), ())),
                            preferred_element_type=jnp.float32)   # (S, tkv)
        m_prev = m_sc[h]                                     # (S, 1)
        m_new = jnp.maximum(m_prev, jnp.max(s, axis=-1, keepdims=True))
        alpha = jnp.exp(m_prev - m_new)
        p = jnp.exp(s - m_new)
        l_sc[h] = alpha * l_sc[h] + jnp.sum(p, axis=-1, keepdims=True)
        acc_sc[h] = alpha * acc_sc[h] + jnp.dot(p, vh,
                                                preferred_element_type=jnp.float32)
        m_sc[h] = m_new

    @pl.when(t == pl.num_programs(1) - 1)
    def _():
        for h in range(n_q_heads):
            inv = pl.reciprocal(l_sc[h], approx=True)        # EUP, off the VALU
            o_ref[0, :, h, :] = (acc_sc[h] * inv).astype(o_ref.dtype)


def flash_attention_gqa(q, k, v, *, n_rep, tkv_pref=512):
    B, S, Hq, Dh = q.shape
    T, Hkv = k.shape[1], k.shape[2]
    tkv = _pick_tile(T, tkv_pref, 8)
    scale = 1.0 / math.sqrt(Dh)
    kernel = partial(_flash_gqa_kernel, scale, n_rep, Hq)
    return pl.pallas_call(
        kernel,
        out_shape=jax.ShapeDtypeStruct((B, S, Hq, Dh), q.dtype),
        grid=(B, T // tkv),
        in_specs=[pl.BlockSpec((1, S, Hq, Dh), lambda b, t: (b, 0, 0, 0)),
                  pl.BlockSpec((1, tkv, Hkv, Dh), lambda b, t: (b, t, 0, 0)),
                  pl.BlockSpec((1, tkv, Hkv, Dh), lambda b, t: (b, t, 0, 0))],
        out_specs=pl.BlockSpec((1, S, Hq, Dh), lambda b, t: (b, 0, 0, 0)),
        scratch_shapes=[pltpu.VMEM((Hq, S, 1), jnp.float32),    # running max
                        pltpu.VMEM((Hq, S, 1), jnp.float32),    # running denom
                        pltpu.VMEM((Hq, S, Dh), jnp.float32)],  # running numer
        compiler_params=pltpu.CompilerParams(
            dimension_semantics=("parallel", "arbitrary"),
            vmem_limit_bytes=VMEM_LIMIT_BYTES),
    )(q, k, v)


# ---------------------------------------------------------------------------
# JAX glue: RoPE, KV cache, block wiring
# ---------------------------------------------------------------------------
def apply_rope(x, cos, sin):
    # x: (B, S, Hn, Dh); cos/sin: (S, Dh//2)
    B, S, Hn, Dh = x.shape
    xr = x.reshape(B, S, Hn, Dh // 2, 2)
    xe, xo = xr[..., 0], xr[..., 1]
    c = cos[None, :, None, :]
    s = sin[None, :, None, :]
    oe = xe * c - xo * s
    oo = xe * s + xo * c
    return jnp.stack([oe, oo], axis=-1).reshape(B, S, Hn, Dh)


def encoder_block(params, x, start_pos, cos, sin, cache_k, cache_v, cfg):
    # NOTE: start_pos must be a static Python int (as in the PyTorch module).
    B, S, D = x.shape
    Hq, Hkv, Dh = cfg["n_heads"], cfg["n_kv_heads"], cfg["head_dim"]
    n_rep = Hq // Hkv
    eps = cfg["eps"]

    # One-time re-layout of nn.Linear weights (out,in) -> (in,out) so the MXU
    # RHS is consumed without transposition. In a real model this is done once
    # at weight-load time, not per call.
    wqkv_t = jnp.concatenate([params["wq"], params["wk"], params["wv"]], axis=0).T
    wo_t = params["wo"].T
    w1_t = params["w1"].T
    w3_t = params["w3"].T
    w2_t = params["w2"].T

    x2d = x.reshape(B * S, D)

    # --- attention branch: fused RMSNorm + QKV projection --------------------
    qkv = rms_matmul(x2d, params["attn_norm_w"], wqkv_t, eps)
    nq, nk = Hq * Dh, Hkv * Dh
    xq = qkv[:, :nq].reshape(B, S, Hq, Dh)
    xk = qkv[:, nq:nq + nk].reshape(B, S, Hkv, Dh)
    xv = qkv[:, nq + nk:].reshape(B, S, Hkv, Dh)

    xq = apply_rope(xq, cos, sin)
    xk = apply_rope(xk, cos, sin)

    # KV-cache update (functional dynamic_update_slice, plain JAX glue)
    cache_k = lax.dynamic_update_slice(cache_k, xk.astype(cache_k.dtype),
                                       (0, start_pos, 0, 0))
    cache_v = lax.dynamic_update_slice(cache_v, xv.astype(cache_v.dtype),
                                       (0, start_pos, 0, 0))
    keys = cache_k[:B, :start_pos + S]        # (B, T, Hkv, Dh) — no repeat
    values = cache_v[:B, :start_pos + S]

    # Flash GQA attention straight on the (B, S/T, H, Dh) layout.
    # TODO(synk): the PyTorch reference applies no causal mask, so none is
    # applied here either.
    attn = flash_attention_gqa(xq, keys, values, n_rep=n_rep)   # (B, S, Hq, Dh)
    attn2d = attn.reshape(B * S, Hq * Dh)

    # Output projection with the residual add folded into the kernel.
    h2d = matmul_residual(attn2d, wo_t, x2d)                    # (B*S, D)

    # --- feed-forward branch: fused RMSNorm + SwiGLU, then down-proj+residual
    g = rms_swiglu(h2d, params["ffn_norm_w"], w1_t, w3_t, eps)  # (B*S, hidden)
    out2d = matmul_residual(g, w2_t, h2d)                       # (B*S, D)

    return out2d.reshape(B, S, D), cache_k, cache_v


# ---------------------------------------------------------------------------
# Pure-JAX reference (semantics mirror of the PyTorch forward) for checking
# ---------------------------------------------------------------------------
def encoder_block_ref(params, x, start_pos, cos, sin, cache_k, cache_v, cfg):
    B, S, D = x.shape
    Hq, Hkv, Dh = cfg["n_heads"], cfg["n_kv_heads"], cfg["head_dim"]
    n_rep = Hq // Hkv
    eps = cfg["eps"]

    def rms(x, w):
        ms = jnp.mean(x * x, axis=-1, keepdims=True)
        return w * (x * lax.rsqrt(ms + eps))

    xn = rms(x, params["attn_norm_w"])
    xq = (xn @ params["wq"].T).reshape(B, S, Hq, Dh)
    xk = (xn @ params["wk"].T).reshape(B, S, Hkv, Dh)
    xv = (xn @ params["wv"].T).reshape(B, S, Hkv, Dh)
    xq = apply_rope(xq, cos, sin)
    xk = apply_rope(xk, cos, sin)
    cache_k = lax.dynamic_update_slice(cache_k, xk, (0, start_pos, 0, 0))
    cache_v = lax.dynamic_update_slice(cache_v, xv, (0, start_pos, 0, 0))
    keys = jnp.repeat(cache_k[:B, :start_pos + S], n_rep, axis=2)
    values = jnp.repeat(cache_v[:B, :start_pos + S], n_rep, axis=2)
    q = jnp.transpose(xq, (0, 2, 1, 3))
    k = jnp.transpose(keys, (0, 2, 1, 3))
    v = jnp.transpose(values, (0, 2, 1, 3))
    scores = jnp.einsum("bhsd,bhtd->bhst", q, k) / math.sqrt(Dh)
    p = jax.nn.softmax(scores, axis=-1)
    o = jnp.einsum("bhst,bhtd->bhsd", p, v)
    o = jnp.transpose(o, (0, 2, 1, 3)).reshape(B, S, Hq * Dh)
    h = x + o @ params["wo"].T

    hn = rms(h, params["ffn_norm_w"])
    h1 = hn @ params["w1"].T
    h3 = hn @ params["w3"].T
    ffn = (h1 * jax.nn.sigmoid(h1) * h3) @ params["w2"].T
    return h + ffn


# ---------------------------------------------------------------------------
if __name__ == "__main__":
    # Small ModelArgs-consistent config
    B, S = 2, 8
    dim, n_heads, n_kv_heads = 64, 4, 2
    head_dim = dim // n_heads                     # 16
    max_batch_size, max_seq_len = 2, 16
    multiple_of = 32
    eps = 1e-5
    start_pos = 0                                 # static Python int

    hidden_dim = 4 * dim
    hidden_dim = int(2 * hidden_dim / 3)
    hidden_dim = multiple_of * ((hidden_dim + multiple_of - 1) // multiple_of)  # 192

    cfg = dict(n_heads=n_heads, n_kv_heads=n_kv_heads, head_dim=head_dim, eps=eps)

    key = jax.random.PRNGKey(0)
    ks = jax.random.split(key, 9)
    scale = 0.05
    params = {
        "attn_norm_w": jnp.ones((dim,), jnp.float32),
        "ffn_norm_w": jnp.ones((dim,), jnp.float32),
        "wq": scale * jax.random.normal(ks[0], (n_heads * head_dim, dim), jnp.float32),
        "wk": scale * jax.random.normal(ks[1], (n_kv_heads * head_dim, dim), jnp.float32),
        "wv": scale * jax.random.normal(ks[2], (n_kv_heads * head_dim, dim), jnp.float32),
        "wo": scale * jax.random.normal(ks[3], (dim, n_heads * head_dim), jnp.float32),
        "w1": scale * jax.random.normal(ks[4], (hidden_dim, dim), jnp.float32),
        "w2": scale * jax.random.normal(ks[5], (dim, hidden_dim), jnp.float32),
        "w3": scale * jax.random.normal(ks[6], (hidden_dim, dim), jnp.float32),
    }

    x = jax.random.normal(ks[7], (B, S, dim), jnp.float32)

    # RoPE frequencies (standard Llama precompute), split into cos/sin
    theta = 1.0 / (10000.0 ** (jnp.arange(0, head_dim, 2, dtype=jnp.float32) / head_dim))
    pos = jnp.arange(start_pos, start_pos + S, dtype=jnp.float32)
    ang = jnp.outer(pos, theta)                   # (S, head_dim//2)
    cos, sin = jnp.cos(ang), jnp.sin(ang)

    cache_k = jnp.zeros((max_batch_size, max_seq_len, n_kv_heads, head_dim), jnp.float32)
    cache_v = jnp.zeros((max_batch_size, max_seq_len, n_kv_heads, head_dim), jnp.float32)

    out, new_ck, new_cv = encoder_block(params, x, start_pos, cos, sin,
                                        cache_k, cache_v, cfg)
    out = jax.block_until_ready(out)

    ref = encoder_block_ref(params, x, start_pos, cos, sin, cache_k, cache_v, cfg)
    assert out.shape == (B, S, dim)
    assert jnp.allclose(out, ref, atol=3e-3, rtol=3e-3), "Pallas output mismatch vs reference"

    print("KERNEL_OK")
</pallas_src>

<mosaic_0001>
module attributes {stable_mosaic.version = 11 : i64} {
  func.func @_rms_matmul_kernel(%arg0: i32, %arg1: i32, %arg2: memref<16x64xf32, #tpu.memory_space<vmem>>, %arg3: memref<1x64xf32, #tpu.memory_space<vmem>>, %arg4: memref<64x128xf32, #tpu.memory_space<vmem>>, %arg5: memref<16x128xf32, #tpu.memory_space<vmem>>) attributes {dimension_semantics = [#tpu.dimension_semantics<parallel>, #tpu.dimension_semantics<parallel>], iteration_bounds = array<i64: 1, 1>, scalar_prefetch = 0 : i64, scratch_operands = 0 : i64, tpu.core_type = #tpu.core_type<tc>, window_params = [{transform_indices = @transform_0, window_bounds = array<i64: 16, 64>}, {pipeline_mode = #tpu.pipeline_mode<synchronous>, transform_indices = @transform_1, window_bounds = array<i64: 1, 64>}, {transform_indices = @transform_2, window_bounds = array<i64: 64, 128>}, {transform_indices = @transform_3, window_bounds = array<i64: 16, 128>}]} {
    %c0 = arith.constant 0 : index
    %c0_0 = arith.constant 0 : index
    %0 = vector.load %arg2[%c0, %c0_0] : memref<16x64xf32, #tpu.memory_space<vmem>>, vector<16x64xf32>
    %1 = arith.mulf %0, %0 : vector<16x64xf32>
    %cst = arith.constant dense<0.000000e+00> : vector<16xf32>
    %2 = vector.multi_reduction <add>, %1, %cst [1] : vector<16x64xf32> to vector<16xf32>
    %3 = vector.shape_cast %2 : vector<16xf32> to vector<16x1xf32>
    %cst_1 = arith.constant 6.400000e+01 : f32
    %4 = vector.broadcast %cst_1 : f32 to vector<16x1xf32>
    %5 = arith.divf %3, %4 : vector<16x1xf32>
    %cst_2 = arith.constant 9.99999974E-6 : f32
    %6 = vector.broadcast %cst_2 : f32 to vector<16x1xf32>
    %7 = arith.addf %5, %6 : vector<16x1xf32>
    %8 = math.rsqrt %7 : vector<16x1xf32>
    %9 = vector.broadcast %8 : vector<16x1xf32> to vector<16x64xf32>
    %10 = arith.mulf %0, %9 : vector<16x64xf32>
    %c0_3 = arith.constant 0 : index
    %c0_4 = arith.constant 0 : index
    %11 = vector.load %arg3[%c0_3, %c0_4] : memref<1x64xf32, #tpu.memory_space<vmem>>, vector<1x64xf32>
    %12 = vector.broadcast %11 : vector<1x64xf32> to vector<16x64xf32>
    %13 = arith.mulf %10, %12 : vector<16x64xf32>
    %c0_5 = arith.constant 0 : index
    %c0_6 = arith.constant 0 : index
    %14 = vector.load %arg4[%c0_5, %c0_6] : memref<64x128xf32, #tpu.memory_space<vmem>>, vector<64x128xf32>
    %cst_7 = arith.constant dense<0.000000e+00> : vector<16x128xf32>
    %15 = tpu.matmul %13, %14, %cst_7 {dimension_numbers = #tpu.dot_dimension_numbers<[1], [0], [0], [1], [0, 0, 1, 1], [], []>} : vector<16x64xf32>, vector<64x128xf32>, vector<16x128xf32> -> vector<16x128xf32>
    %c0_8 = arith.constant 0 : index
    %c0_9 = arith.constant 0 : index
    %16 = vector.load %arg5[%c0_8, %c0_9] : memref<16x128xf32, #tpu.memory_space<vmem>>, vector<16x128xf32>
    tpu.vector_store %arg5[%c0_8, %c0_9], %15 {strides = array<i32>} : memref<16x128xf32, #tpu.memory_space<vmem>>, vector<16x128xf32>,
    return
  }
  func.func @transform_0(%arg0: i32, %arg1: i32) -> (i32, i32) {
    %c0_i32 = arith.constant 0 : i32
    %c0_i32_0 = arith.constant 0 : i32
    return %arg0, %c0_i32 : i32, i32
  }
  func.func @transform_1(%arg0: i32, %arg1: i32) -> (i32, i32) {
    %c0_i32 = arith.constant 0 : i32
    %c0_i32_0 = arith.constant 0 : i32
    %c0_i32_1 = arith.constant 0 : i32
    return %c0_i32, %c0_i32_0 : i32, i32
  }
  func.func @transform_2(%arg0: i32, %arg1: i32) -> (i32, i32) {
    %c0_i32 = arith.constant 0 : i32
    %c0_i32_0 = arith.constant 0 : i32
    return %c0_i32, %arg1 : i32, i32
  }
  func.func @transform_3(%arg0: i32, %arg1: i32) -> (i32, i32) {
    %c0_i32 = arith.constant 0 : i32
    return %arg0, %arg1 : i32, i32
  }
}

</mosaic_0001>

<bundles_post_ra>
// kernel: tpu_custom_call.1
= control target key start
LH: loop header
LB: loop body
LE: loop exit
PB: predicated region body
PF: predicated region fallthrough
CT: control target
= control target key end

     0   :  { %8 = vsyncpa [#allocation3], 0  ;;  %s357_s0 = inlined_call_operand.hbm [shape: f32[16,64], index: 0, kind: input, shape index: {}]   ;;  %s358_s1 = inlined_call_operand.hbm [shape: f32[1,64], index: 1, kind: input, shape index: {}]   ;;  %s359_s2 = inlined_call_operand.hbm [shape: f32[64,128], index: 2, kind: input, shape index: {}]   ;;  %s360_s3 = inlined_call_operand.hbm [shape: f32[16,128], index: 3, kind: output, shape index: {}]  }
   0x1   :  { %9 = vsyncpa [#allocation6], 0  ;;  %s29_s14 = sshll.u32 %s358_s1, 4  ;;  %s30_s14 = int_to_ptr.hbm [resolvable:$true] %s29_s14 }
   0x2   :  { %10 = vsyncpa [#allocation4], 0  ;;  %s295_s15 = smov [#allocation5]   ;;  %s15_s19 = sshll.u32 %s357_s0, 4  ;;  %s16_s19 = int_to_ptr.hbm [resolvable:$true] %s15_s19 }
   0x3   :  { %s31_s16 = sshll.u32 %s295_s15, 4  ;;  %s296_s20 = smov [#allocation2]   ;;  %s32_s16 = int_to_ptr.vmem [resolvable:$true] %s31_s16 }
   0x4   :  { %34 = dma.hbm_to_vmem [thread:$0]  %s30_s14, 16, %s32_s16, [#allocation6]  }
   0x5   :  { %s17_s21 = sshll.u32 %s296_s20, 4  ;;  %s297_s22 = smov 128   ;;  %s18_s21 = int_to_ptr.vmem [resolvable:$true] %s17_s21 }
   0x6   :  { %s298_s23 = smov 8   ;;  %s39_s25 = sshll.u32 %s359_s2, 4  ;;  %s40_s25 = int_to_ptr.hbm [resolvable:$true] %s39_s25 }
   0x7   :  { %23 = dma.hbm_to_vmem [thread:$0]  %s16_s19, 256, %s18_s21, [#allocation3], %s297_s22, %s297_s22, %s298_s23  }
   0x8   :  { %s299_s26 = smov [#allocation7]  }
   0x9   :  { %s41_s27 = sshll.u32 %s299_s26, 4  ;;  %s42_s27 = int_to_ptr.vmem [resolvable:$true] %s41_s27 }
   0xa   :  { %47 = dma.hbm_to_vmem [thread:$0]  %s40_s25, 1024, %s42_s27, [#allocation6], %s297_s22, %s297_s22, %s298_s23  }
   0xb   :  { %289 = dma.done.wait [#allocation3], 256  }
   0xc   :  { %290 = vsyncadd [#allocation3], 4294967040 }
   0xd   :  { %291 = dma.done.wait [#allocation6], 1040  }
   0xe   :  { %292 = vsyncadd [#allocation6], 4294966256  ;;  %v337_v0 = vld [vmem:[#allocation2] sm:$0xff]  ;;  %vm64_vm0 = vcmask 523264   ;;  %v341_v2 = vld [vmem:[#allocation2 + $0x8] sm:$0xff]  ;;  %v300_v6 = vmov 64.0  }
   0xf   :  { %v62_v1 = vmul.f32 %v337_v0, %v337_v0  ;;  %v63_v4 = vmul.f32 %v341_v2, %v341_v2  ;;  %187 = vrcp.f32 %v300_v6  ;;  %v117_v8 = vld [vmem:[#allocation7 + $0x38] sm:$0xff]  ;;  %v116_v9 = vld [vmem:[#allocation7 + $0x30] sm:$0xff]  ;;  %v115_v11 = vld [vmem:[#allocation7 + $0x28] sm:$0xff]  ;;  %s301_s0 = smov [#allocation8]   ;;  %s155_s30 = sshll.u32 %s360_s3, 4  ;;  %s156_s30 = int_to_ptr.hbm [resolvable:$true] %s155_s30 }
  0x10   :  { %132 = vmatpush.msra.mxu0 %v117_v8  ;;  %171 = vmatpush.msra.mxu1 %v117_v8  ;;  %v114_v12 = vld [vmem:[#allocation7 + $0x20] sm:$0xff]  ;;  %v113_v14 = vld [vmem:[#allocation7 + $0x18] sm:$0xff]  ;;  %v112_v15 = vld [vmem:[#allocation7 + $0x10] sm:$0xff]  ;;  %s153_s2 = sshll.u32 %s301_s0, 4  ;;  %s154_s2 = int_to_ptr.vmem [resolvable:$true] %s153_s2 }
  0x11   :  { %v65_v3 = vsel %vm64_vm0, %v62_v1, 0.0  ;;  %v68_v5 = vsel %vm64_vm0, %v63_v4, 0.0  ;;  %v111_v17 = vld [vmem:[#allocation7 + $0x8] sm:$0xff]  ;;  %v110_v18 = vld [vmem:[#allocation7] sm:$0xff]  ;;  %v186_v35 = vld [vmem:[#allocation5] ss:$0 sm:$0xff] }
  0x12   :  { %66 = vadd.xlane.f32.xlu0 %v65_v3  ;;  %133 = vmatpush.msra.mxu0 %v116_v9 }
  0x13   :  { %172 = vmatpush.msra.mxu1 %v116_v9 }
  0x14   :  { %134 = vmatpush.msra.mxu0 %v115_v11 }
  0x15   :  { %v188_v7 = vpop.eup %187  ;;  %173 = vmatpush.msra.mxu1 %v115_v11 }
  0x16   :  { %v72_v10 = vmul.f32 64.0, %v188_v7  ;;  %135 = vmatpush.msra.mxu0 %v114_v12  ;;  %vm76_vm1 = vweird.f32 %v188_v7 }
  0x17   :  { %174 = vmatpush.msra.mxu1 %v114_v12 }
  0x18   :  { %v73_v13 = vsub.f32 1.0, %v72_v10  ;;  %136 = vmatpush.msra.mxu0 %v113_v14 }
  0x19   :  { %175 = vmatpush.msra.mxu1 %v113_v14 }
  0x1a   :  { %69 = vadd.xlane.f32.xlu0 %v68_v5  ;;  %v74_v16 = vmul.f32 %v188_v7, %v73_v13  ;;  %137 = vmatpush.msra.mxu0 %v112_v15 }
  0x1b   :  { %176 = vmatpush.msra.mxu1 %v112_v15 }
  0x1c   :  { %138 = vmatpush.msra.mxu0 %v111_v17  ;;  %v75_v19 = vadd.f32 %v188_v7, %v74_v16 }
  0x1d   :  { %177 = vmatpush.msra.mxu1 %v111_v17 }
  0x1e   :  { %139 = vmatpush.msra.mxu0 %v110_v18  ;;  %v77_v20 = vsel %vm76_vm1, %v188_v7, %v75_v19 }
  0x1f   :  { %178 = vmatpush.msra.mxu1 %v110_v18 }
  0x85   :  { %v67_v21 = vpop.xlane.xlu0 %66 }
  0x86   :  { %v78_v22 = vmul.f32 %v77_v20, %v67_v21 }
  0x88   :  { %v80_v23 = vadd.f32 1e-05, %v78_v22 }
  0x8a   :  { %189 = vrsqrt.f32 %v80_v23  ;;  %vm88_vm3 = vweird.f32 %v80_v23 }
  0x8d   :  { %v70_v24 = vpop.xlane.xlu0 %69 }
  0x8e   :  { %v79_v25 = vmul.f32 %v77_v20, %v70_v24 }
  0x90   :  { %v190_v26 = vpop.eup %189  ;;  %v81_v27 = vadd.f32 1e-05, %v79_v25 }
  0x91   :  { %v83_v28 = vmul.f32 %v190_v26, %v80_v23  ;;  %vm89_vm2 = vweird.f32 %v190_v26 }
  0x92   :  { %191 = vrsqrt.f32 %v81_v27  ;;  %vm90_vm4 = vmor %vm88_vm3, %vm89_vm2  ;;  %vm98_vm6 = vweird.f32 %v81_v27 }
  0x93   :  { %v84_v29 = vmul.f32 %v190_v26, %v83_v28 }
  0x95   :  { %v85_v30 = vmul.f32 0.5, %v84_v29 }
  0x97   :  { %v86_v31 = vsub.f32 1.5, %v85_v30 }
  0x98   :  { %v192_v32 = vpop.eup %191 }
  0x99   :  { %v87_v33 = vmul.f32 %v190_v26, %v86_v31  ;;  %v93_v34 = vmul.f32 %v192_v32, %v81_v27  ;;  %vm99_vm5 = vweird.f32 %v192_v32 }
  0x9a   :  { %vm100_vm7 = vmor %vm98_vm6, %vm99_vm5 }
  0x9b   :  { %v94_v36 = vmul.f32 %v192_v32, %v93_v34  ;;  %v91_v37 = vsel %vm90_vm4, %v190_v26, %v87_v33 }
  0x9c   :  { %v102_v38 = vmul.f32 %v91_v37, %v337_v0 }
  0x9d   :  { %v95_v39 = vmul.f32 0.5, %v94_v36 }
  0x9e   :  { %v108_v40 = vmul.f32 %v186_v35, %v102_v38 }
  0x9f   :  { %v96_v41 = vsub.f32 1.5, %v95_v39 }
  0xa0   :  { %169 = vmatmul.msk.f32.vlgmr.msra.gmra.mxu0 %vm64_vm0, %v108_v40 }
  0xa1   :  { %v97_v42 = vmul.f32 %v192_v32, %v96_v41 }
  0xa3   :  { %v101_v43 = vsel %vm100_vm7, %v192_v32, %v97_v42 }
  0xa4   :  { %v103_v44 = vmul.f32 %v101_v43, %v341_v2 }
  0xa6   :  { %v109_v45 = vmul.f32 %v186_v35, %v103_v44 }
  0xa8   :  { %170 = vmatmul.msk.f32.vlgmr.msra.gmra.mxu1 %vm64_vm0, %v109_v45 }
 0x11d   :  { %v141_v46 = vpop.f32.mrf.mxu0 }
 0x11e   :  { %147 = vst [vmem:[#allocation8] sm:$0xff] %v141_v46 }
 0x125   :  { %v144_v47 = vpop.f32.mrf.mxu1 }
 0x126   :  { %148 = vst [vmem:[#allocation8 + $0x8] sm:$0xff] %v144_v47 }
 0x127   :  { %161 = dma.vmem_to_hbm [thread:$0]  %s154_s2, 256, %s156_s30, [#allocation4], %s297_s22, %s297_s22, %s298_s23  }
 0x128   :  { %293 = dma.done.wait [#allocation4], 256  }
 0x129   :  { %294 = vsyncadd [#allocation4], 4294967040 }
 0x12a   :  { %166 = vsyncpa [#allocation3], 1 }
 0x12b   :  { %167 = vsyncpa [#allocation6], 1 }
 0x12c   :  { %168 = vsyncpa [#allocation4], 1 }

</bundles_post_ra>
